<compile_context>
chip_gen: v7x
topology: tpu7x:2x2x1
jax: 0.10.0
libtpu: 0.0.40
codegen_flags: <defaults>
</compile_context>

<pallas_src>
import functools

import jax
import jax.numpy as jnp
from jax.experimental import pallas as pl
from jax.experimental.pallas import tpu as pltpu


# ----------------------------- Pallas kernel ------------------------------

def _scale_kernel(neg_coeff_ref, g_ref, o_ref):
    # backward hot path: (-coeff) * grad.  Negation already folded into the
    # SMEM scalar; cast the scalar (not the vector) so the VPU multiply stays
    # in the gradient dtype (matters on v5e for bf16 grads).
    o_ref[...] = g_ref[...] * neg_coeff_ref[0].astype(o_ref.dtype)


_LANE = 128
_MAX_LANE_WIDTH = 8192                 # lane-dense slab width (multiple of 128)
_TARGET_BLOCK_BYTES = 2 * 1024 * 1024  # ~2 MiB per block: near HBM roofline,
                                       # fits every generation's VMEM budget.


def _pick_lane_width(n):
    """Largest power-of-two multiple of 128 (<= 8192) that divides n exactly."""
    w = _MAX_LANE_WIDTH
    while w > _LANE and n % w != 0:
        w //= 2
    return w


def _neg_scale_pallas(coeff, g):
    """Compute -coeff * g with a tiled, lane-dense Pallas kernel."""
    n = g.size
    dtype = g.dtype
    if n == 0:
        return g

    neg_coeff = jnp.asarray(-coeff, dtype=jnp.float32).reshape(1)

    if n % _LANE != 0:
        # Ragged size: a single fused XLA elementwise pass is already at the
        # HBM roofline; a padded Pallas launch would only add extra copies.
        return neg_coeff[0].astype(dtype) * g

    w = _pick_lane_width(n)            # divides n exactly -> no padding
    rows = n // w
    slab = g.reshape(rows, w)          # contiguous reshape, no extra HBM pass

    itemsize = jnp.dtype(dtype).itemsize
    # Sublane packing: 8 rows/vreg for 32-bit, 16 for 16-bit, 32 for 8-bit.
    sub = 8 if itemsize >= 4 else (16 if itemsize == 2 else 32)
    rows_per_block = max(1, _TARGET_BLOCK_BYTES // (w * itemsize))
    if rows <= rows_per_block:
        block_rows = rows              # whole-extent block (legal even if < 8)
    else:
        block_rows = max(sub, (rows_per_block // sub) * sub)

    grid = (pl.cdiv(rows, block_rows),)

    out = pl.pallas_call(
        _scale_kernel,
        out_shape=jax.ShapeDtypeStruct((rows, w), dtype),
        grid_spec=pltpu.PrefetchScalarGridSpec(
            num_scalar_prefetch=0,
            grid=grid,
            in_specs=[
                pl.BlockSpec(memory_space=pltpu.MemorySpace.SMEM),  # -coeff
                pl.BlockSpec((block_rows, w), lambda i: (i, 0)),
            ],
            out_specs=pl.BlockSpec((block_rows, w), lambda i: (i, 0)),
        ),
        compiler_params=pltpu.CompilerParams(
            # Single mem-bound axis: "parallel" lets v7x shard it across its
            # two TensorCores; no-op on v5e/v6e.
            dimension_semantics=("parallel",)),
    )(neg_coeff, slab)
    return out.reshape(g.shape)


# ----------------------- gradient-reverse custom_vjp -----------------------

@functools.partial(jax.custom_vjp, nondiff_argnums=(0,))
def gradient_reverse(coeff, x):
    # Forward is the identity: no kernel, no copy, zero HBM traffic.
    return x


def _grl_fwd(coeff, x):
    return x, None


def _grl_bwd(coeff, _residual, g):
    # PyTorch returns (None, -coeff * grad); coeff is non-differentiable.
    return (_neg_scale_pallas(coeff, g),)


gradient_reverse.defvjp(_grl_fwd, _grl_bwd)


# --------------------------- module-like wrapper ---------------------------

class GradientReverseModule:
    """Mirrors scRDAN GradientReverseModule: stateful step counter + scheduler."""

    def __init__(self, scheduler):
        self.scheduler = scheduler
        self.global_step = 0.0
        self.coeff = 0.0

    def __call__(self, x):
        # TODO(synk): host-side Python state (global_step/coeff), same as nn.Module.
        self.coeff = float(self.scheduler(self.global_step))
        self.global_step += 1.0
        return gradient_reverse(self.coeff, x)


# Typical scheduler used with this module in scRDAN (aToBSheduler-style ramp).
def default_scheduler(step, gamma=10.0, max_iter=10000.0, a=0.0, b=1.0):
    import math
    p = step / max_iter
    return a + (b - a) * (2.0 / (1.0 + math.exp(-gamma * p)) - 1.0)


# --------------------------------- main -----------------------------------

if __name__ == "__main__":
    key = jax.random.PRNGKey(0)
    x = jax.random.normal(key, (2, 4, 16, 16), dtype=jnp.float32)  # NCHW

    grl = GradientReverseModule(default_scheduler)

    # Forward: identity (pass-through, no kernel).
    y = jax.block_until_ready(grl(x))
    assert y.shape == x.shape and y.dtype == x.dtype
    assert jnp.allclose(y, x), "forward must be identity"

    # Backward check with a non-zero coeff: grad of sum(y) w.r.t. x == -coeff.
    coeff = 0.75

    def loss(inp):
        return jnp.sum(gradient_reverse(coeff, inp))

    gx = jax.block_until_ready(jax.grad(loss)(x))  # runs the Pallas backward kernel
    assert jnp.allclose(gx, jnp.full_like(x, -coeff)), "backward must be -coeff * g"

    # Exercise the tiled multi-block path of the backward kernel directly.
    g_big = jax.random.normal(jax.random.PRNGKey(1), (8, 128, 32, 32),
                              dtype=jnp.float32)                      # 4 MiB -> 2 blocks
    out_big = jax.block_until_ready(_neg_scale_pallas(1.25, g_big))
    assert jnp.allclose(out_big, -1.25 * g_big, rtol=1e-6, atol=1e-6)

    # Ragged (non-128-divisible) size uses the fused-XLA fallback path.
    x_odd = jax.random.normal(jax.random.PRNGKey(2), (3, 5, 7), dtype=jnp.float32)
    gx_odd = jax.block_until_ready(
        jax.grad(lambda a: jnp.sum(gradient_reverse(coeff, a)))(x_odd))
    assert jnp.allclose(gx_odd, jnp.full_like(x_odd, -coeff))

    print("KERNEL_OK")
</pallas_src>

<mosaic_0001>
module attributes {stable_mosaic.version = 11 : i64} {
  func.func @_scale_kernel(%arg0: i32, %arg1: memref<1xf32, #tpu.memory_space<smem>>, %arg2: memref<1x2048xf32, #tpu.memory_space<vmem>>, %arg3: memref<1x2048xf32, #tpu.memory_space<vmem>>) attributes {dimension_semantics = [#tpu.dimension_semantics<parallel>], iteration_bounds = array<i64: 1>, scalar_prefetch = 0 : i64, scratch_operands = 0 : i64, tpu.core_type = #tpu.core_type<tc>, window_params = [{transform_indices = @transform_0, window_bounds = array<i64: 1>}, {transform_indices = @transform_1, window_bounds = array<i64: 1, 2048>}, {transform_indices = @transform_2, window_bounds = array<i64: 1, 2048>}]} {
    %c0 = arith.constant 0 : index
    %c0_0 = arith.constant 0 : index
    %0 = vector.load %arg2[%c0, %c0_0] : memref<1x2048xf32, #tpu.memory_space<vmem>>, vector<1x2048xf32>
    %c0_1 = arith.constant 0 : index
    %1 = memref.load %arg1[%c0_1] : memref<1xf32, #tpu.memory_space<smem>>
    %2 = vector.broadcast %1 : f32 to vector<1x2048xf32>
    %3 = arith.mulf %0, %2 : vector<1x2048xf32>
    %c0_2 = arith.constant 0 : index
    %c0_3 = arith.constant 0 : index
    %4 = vector.load %arg3[%c0_2, %c0_3] : memref<1x2048xf32, #tpu.memory_space<vmem>>, vector<1x2048xf32>
    tpu.vector_store %arg3[%c0_2, %c0_3], %3 {strides = array<i32>} : memref<1x2048xf32, #tpu.memory_space<vmem>>, vector<1x2048xf32>,
    return
  }
  func.func @transform_0(%arg0: i32) -> i32 {
    %c0_i32 = arith.constant 0 : i32
    %c0_i32_0 = arith.constant 0 : i32
    return %c0_i32 : i32
  }
  func.func @transform_1(%arg0: i32) -> (i32, i32) {
    %c0_i32 = arith.constant 0 : i32
    %c0_i32_0 = arith.constant 0 : i32
    return %arg0, %c0_i32 : i32, i32
  }
  func.func @transform_2(%arg0: i32) -> (i32, i32) {
    %c0_i32 = arith.constant 0 : i32
    %c0_i32_0 = arith.constant 0 : i32
    return %arg0, %c0_i32 : i32, i32
  }
}

</mosaic_0001>

<bundles_post_ra>
// kernel: tpu_custom_call.1
= control target key start
LH: loop header
LB: loop body
LE: loop exit
PB: predicated region body
PF: predicated region fallthrough
CT: control target
= control target key end

     0   :  { %8 = vsyncpa [#allocation4], 0  ;;  %s142_s0 = inlined_call_operand.<no memory space> [shape: f32[1], index: 0, kind: input, shape index: {}]   ;;  %s143_s1 = inlined_call_operand.hbm [shape: f32[1,2048], index: 1, kind: input, shape index: {}]   ;;  %s144_s2 = inlined_call_operand.hbm [shape: f32[1,2048], index: 2, kind: output, shape index: {}]  }
   0x1   :  { %9 = vsyncpa [#allocation5], 0  ;;  %s98_s9 = smov [#allocation3]   ;;  %s50_s13 = scalar_lea.hbm %s143_s1, 256 }
   0x2   :  { %s18_s10 = sshll.u32 %s98_s9, 4  ;;  %p51_p0 = scmp.ne.s32.totalorder %s143_s1, %s50_s13  ;;  %s19_s10 = int_to_ptr.vmem [resolvable:$true] %s18_s10 }
   0x3   :  { %p54_p1 = scmp.lt.u32.totalorder %s50_s13, %s143_s1 }
   0x5   :  { %p56_p2 = pnand %p54_p1, %p51_p0 }
   0x7   :  { %59 = shalt.err (!%p56_p2)
}
   0x8   :  { %s60_s18 = scalar_lea.vmem %s19_s10, 256  ;;  %p65_p4 = scmp.lt.s32.totalorder %s19_s10, %s19_s10 }
   0x9   :  { %p61_p3 = scmp.ne.s32.totalorder %s19_s10, %s60_s18  ;;  %p66_p5 = scmp.lt.s32.totalorder %s60_s18, %s60_s18 }
   0xb   :  { %p67_p6 = por %p66_p5, %p65_p4 }
   0xd   :  { %p68_p7 = pnand %p67_p6, %p61_p3 }
   0xf   :  { %71 = shalt.err (!%p68_p7)
}
  0x10   :  { %21 = dma.hbm_to_vmem [thread:$0]  %s143_s1, 256, %s19_s10, [#allocation4]  }
  0x11   :  { %94 = dma.done.wait [#allocation4], 256  }
  0x12   :  { %95 = vsyncadd [#allocation4], 4294967040  ;;  %v28_v0 = vstv %s142_s0  ;;  %s99_s23 = smov [#allocation6]   ;;  %v25_v1 = vld [vmem:[#allocation3] sm:$0xff]  ;;  %v26_v2 = vld [vmem:[#allocation3 + $0x8] sm:$0xff] }
  0x13   :  { %s39_s24 = sshll.u32 %s99_s23, 4  ;;  %v29_v3 = vmul.f32 %v28_v0, %v25_v1  ;;  %v30_v4 = vmul.f32 %v28_v0, %v26_v2  ;;  %s40_s24 = int_to_ptr.vmem [resolvable:$true] %s39_s24 }
  0x14   :  { %s72_s25 = scalar_lea.vmem %s40_s24, 256  ;;  %p77_p9 = scmp.lt.s32.totalorder %s40_s24, %s40_s24 }
  0x15   :  { %31 = vst [vmem:[#allocation6] sm:$0xff] %v29_v3  ;;  %32 = vst [vmem:[#allocation6 + $0x8] sm:$0xff] %v30_v4  ;;  %p73_p8 = scmp.ne.s32.totalorder %s40_s24, %s72_s25  ;;  %p78_p10 = scmp.lt.s32.totalorder %s72_s25, %s72_s25 }
  0x17   :  { %p79_p11 = por %p78_p10, %p77_p9 }
  0x19   :  { %p80_p12 = pnand %p79_p11, %p73_p8 }
  0x1b   :  { %83 = shalt.err (!%p80_p12)
}
  0x1c   :  { %s84_s0 = scalar_lea.hbm %s144_s2, 256 }
  0x1d   :  { %p85_p13 = scmp.ne.s32.totalorder %s144_s2, %s84_s0  ;;  %p88_p0 = scmp.lt.u32.totalorder %s84_s0, %s144_s2 }
  0x1f   :  { %p90_p1 = pnand %p88_p0, %p85_p13 }
  0x21   :  { %93 = shalt.err (!%p90_p1)
}
  0x22   :  { %42 = dma.vmem_to_hbm [thread:$0]  %s40_s24, 256, %s144_s2, [#allocation5]  }
  0x23   :  { %96 = dma.done.wait [#allocation5], 256  }
  0x24   :  { %97 = vsyncadd [#allocation5], 4294967040 }
  0x25   :  { %46 = vsyncpa [#allocation4], 1 }
  0x26   :  { %47 = vsyncpa [#allocation5], 1 }

</bundles_post_ra>
